<compile_context>
chip_gen: v6e
topology: v6e:2x2x1
jax: 0.10.0
libtpu: 0.0.40
codegen_flags: <defaults>
</compile_context>

<pallas_src>
import jax
import jax.numpy as jnp
from jax.experimental import pallas as pl
from jax.experimental.pallas import tpu as pltpu


# -----------------------------------------------------------------------------
# Kernel: 3 MXU passes over resident fused weights; combine folded into w2/b2.
# -----------------------------------------------------------------------------
def qnet_duel_kernel(s_ref, wh_ref, bh_ref, w1_ref, b1_ref, w2_ref, b2_ref,
                     q_ref):
    mxu_dtype = wh_ref.dtype   # f32 (parity mode) or bf16 (v6e/v7x fast path)

    # Head: Linear + ReLU                                    (TB, mid)   f32
    x = jnp.dot(s_ref[...].astype(mxu_dtype), wh_ref[...],
                preferred_element_type=jnp.float32)
    x = jnp.maximum(x + bh_ref[...], 0.0)

    # Fused value/advantage hidden layer (one MXU pass)      (TB, 2*mid) f32
    #   h[:, :mid] == relu(x @ Wv1 + bv1),  h[:, mid:] == relu(x @ Wa1 + ba1)
    h = jnp.dot(x.astype(mxu_dtype), w1_ref[...],
                preferred_element_type=jnp.float32)
    h = jnp.maximum(h + b1_ref[...], 0.0)

    # Fused, folded output layer (one MXU pass).  Columns 0..A-1 of `o`
    # already hold q = val + adv - mean(adv); padded lanes are exact zeros.
    o = jnp.dot(h.astype(mxu_dtype), w2_ref[...],
                preferred_element_type=jnp.float32) + b2_ref[...]

    # Epilogue is just the store of the useful lanes (q block is (TB, A)).
    q_ref[...] = o[:, :q_ref.shape[-1]]


# -----------------------------------------------------------------------------
# Parameter fusion (done ONCE outside the hot loop).
# -----------------------------------------------------------------------------
def fuse_params(p, *, mxu_dtype=jnp.float32):
    """Pack PyTorch-style (transposed) per-layer params into fused tensors.

    The dueling combine is folded into layer 2 (mean is linear):
      q = h_v @ Wv2 . 1_A  +  h_a @ (Wa2 - colmean(Wa2))  +  (bv2 + ba2 - mean(ba2))
    """
    mid = p["wh"].shape[1]
    action_dim = p["wa2"].shape[1]
    npad = 128 * pl.cdiv(action_dim, 128)   # MXU lane width of fused layer 2

    # Layer-1 fusion: h = relu(x @ [Wv1 | Wa1] + [bv1 | ba1])
    w1 = jnp.concatenate([p["wv1"], p["wa1"]], axis=1)          # (mid, 2*mid)
    b1 = jnp.concatenate([p["bv1"], p["ba1"]], axis=1)          # (1, 2*mid)

    # Layer-2 fusion + folded dueling combine (block structure, lane padded):
    #   rows 0..mid-1   (value hidden)     -> Wv2 broadcast across all A cols
    #   rows mid..2m-1  (advantage hidden) -> Wa2 - column mean
    wa2c = p["wa2"] - jnp.mean(p["wa2"], axis=1, keepdims=True)
    ba2c = p["ba2"] - jnp.mean(p["ba2"], axis=1, keepdims=True)
    w2 = jnp.zeros((2 * mid, npad), jnp.float32)
    w2 = w2.at[:mid, :action_dim].set(jnp.broadcast_to(p["wv2"],
                                                       (mid, action_dim)))
    w2 = w2.at[mid:, :action_dim].set(wa2c)
    b2 = jnp.zeros((1, npad), jnp.float32)
    b2 = b2.at[:, :action_dim].set(ba2c + p["bv2"][0, 0])

    # MXU operands in mxu_dtype (bf16 for v6e/v7x throughput + halved weight
    # reads); biases and the ReLU/bias epilogue stay f32 (v5e VPU has no bf16),
    # accumulation is always f32 via preferred_element_type.
    return dict(
        wh=p["wh"].astype(mxu_dtype), bh=p["bh"].astype(jnp.float32),
        w1=w1.astype(mxu_dtype),      b1=b1.astype(jnp.float32),
        w2=w2.astype(mxu_dtype),      b2=b2.astype(jnp.float32),
        action_dim=action_dim)


# -----------------------------------------------------------------------------
# Wrapper
# -----------------------------------------------------------------------------
def _round_up(x, m):
    return ((x + m - 1) // m) * m


def _choose_batch_tile(B, state_dim, mid, npad, weight_bytes,
                       requested=2048, vmem_budget=24 * 1024 * 1024):
    """Largest batch tile that fits the VMEM budget (safe for v7x's 64 MiB),
    capped so large batches still give >= 2 grid steps for megacore."""
    in_row = _round_up(state_dim, 128) * 4        # state block row (lane-padded)
    out_row = 128 * 4                             # q block row (lane-padded VMEM)
    interm_row = (mid + 2 * mid + npad) * 4       # x, h, o f32 intermediates
    per_row = 2 * (in_row + out_row) + interm_row # in/out double-buffered
    budget_rows = max((vmem_budget - 2 * weight_bytes) // per_row, 8)
    tb = int(min(requested, budget_rows))

    if B <= tb:
        if B >= 16:
            # Split so the "parallel" batch axis lands on both v7x TensorCores
            # (harmless on single-TC v5e/v6e).
            half = _round_up(pl.cdiv(B, 2), 8)
            return half if half < B else B
        return B                    # single full block (exempt from (8,128))
    return max((tb // 8) * 8, 8)


def qnet_duel_forward(state, fused, *, block_b=2048):
    """state: (B, state_dim) f32. fused: output of fuse_params."""
    B, state_dim = state.shape
    action_dim = fused["action_dim"]
    mid = fused["wh"].shape[1]
    npad = fused["w2"].shape[1]

    weights = (fused["wh"], fused["bh"], fused["w1"], fused["b1"],
               fused["w2"], fused["b2"])
    weight_bytes = sum(int(w.size) * w.dtype.itemsize for w in weights)

    TB = _choose_batch_tile(B, state_dim, mid, npad, weight_bytes,
                            requested=block_b)
    grid_b = pl.cdiv(B, TB)         # boundary block (if any) handled by Pallas

    # Weights use a constant block index so they are DMA'd once and stay
    # VMEM-resident across all batch-grid iterations.
    # NOTE: at large mid_dim on v7x, add pipeline_mode=pl.Buffered(1) here so
    # resident weights are not pointlessly double-buffered (negligible at the
    # demo sizes).
    def resident(a):
        return pl.BlockSpec(a.shape, lambda i: (0,) * a.ndim)

    flops = 2 * grid_b * TB * (state_dim * mid + mid * (2 * mid)
                               + (2 * mid) * npad)
    bytes_accessed = (int(state.size) * state.dtype.itemsize
                      + B * action_dim * 4
                      + weight_bytes)

    return pl.pallas_call(
        qnet_duel_kernel,
        out_shape=jax.ShapeDtypeStruct((B, action_dim), jnp.float32),
        grid=(grid_b,),
        in_specs=[pl.BlockSpec((TB, state_dim), lambda i: (i, 0))]
                + [resident(w) for w in weights],
        out_specs=pl.BlockSpec((TB, action_dim), lambda i: (i, 0)),
        compiler_params=pltpu.CompilerParams(
            dimension_semantics=("parallel",),      # shard batch across v7x TCs
            vmem_limit_bytes=32 * 1024 * 1024),
        cost_estimate=pl.CostEstimate(flops=flops, transcendentals=0,
                                      bytes_accessed=bytes_accessed),
    )(state, *weights)


# -----------------------------------------------------------------------------
# Deterministic synthetic parameters + plain-JAX reference
# -----------------------------------------------------------------------------
def init_params(key, state_dim, action_dim, mid_dim):
    """PyTorch nn.Linear-style parameters, stored transposed (in, out)."""
    ks = jax.random.split(key, 10)

    def linear(kw, kb, fan_in, fan_out):
        bound = 1.0 / jnp.sqrt(jnp.float32(fan_in))
        w = jax.random.uniform(kw, (fan_in, fan_out), jnp.float32, -bound, bound)
        b = jax.random.uniform(kb, (1, fan_out), jnp.float32, -bound, bound)
        return w, b

    wh,  bh  = linear(ks[0], ks[1], state_dim, mid_dim)
    wv1, bv1 = linear(ks[2], ks[3], mid_dim, mid_dim)
    wv2, bv2 = linear(ks[4], ks[5], mid_dim, 1)
    wa1, ba1 = linear(ks[6], ks[7], mid_dim, mid_dim)
    wa2, ba2 = linear(ks[8], ks[9], mid_dim, action_dim)
    return dict(wh=wh, bh=bh, wv1=wv1, bv1=bv1, wv2=wv2, bv2=bv2,
                wa1=wa1, ba1=ba1, wa2=wa2, ba2=ba2)


def reference_forward(state, p):
    """Plain-JAX reference mirroring the PyTorch module."""
    x = jnp.maximum(state @ p["wh"] + p["bh"], 0.0)
    hv = jnp.maximum(x @ p["wv1"] + p["bv1"], 0.0)
    val = hv @ p["wv2"] + p["bv2"]
    ha = jnp.maximum(x @ p["wa1"] + p["ba1"], 0.0)
    adv = ha @ p["wa2"] + p["ba2"]
    return val + adv - jnp.mean(adv, axis=1, keepdims=True)


if __name__ == "__main__":
    state_dim, action_dim, mid_dim = 16, 4, 32
    batch = 8

    key = jax.random.PRNGKey(0)
    k_state, k_params = jax.random.split(key)

    state = jax.random.normal(k_state, (batch, state_dim), jnp.float32)
    params = init_params(k_params, state_dim, action_dim, mid_dim)
    q_ref = reference_forward(state, params)

    # f32 parity mode (matches the f32 reference to f32 rounding of the fold).
    fused_f32 = fuse_params(params, mxu_dtype=jnp.float32)
    q = jax.block_until_ready(qnet_duel_forward(state, fused_f32))
    assert q.shape == (batch, action_dim)
    assert jnp.allclose(q, q_ref, atol=2e-5, rtol=2e-5), "f32 kernel mismatch"

    # bf16 MXU-operand mode (v6e/v7x fast path; f32 accumulate + f32 epilogue).
    fused_bf16 = fuse_params(params, mxu_dtype=jnp.bfloat16)
    q_bf16 = jax.block_until_ready(qnet_duel_forward(state, fused_bf16))
    assert q_bf16.shape == (batch, action_dim)
    assert jnp.allclose(q_bf16, q_ref, atol=5e-2, rtol=5e-2), "bf16 kernel mismatch"

    print("KERNEL_OK")
</pallas_src>

<mosaic_0001>
module attributes {stable_mosaic.version = 11 : i64} {
  func.func @qnet_duel_kernel(%arg0: i32, %arg1: memref<8x16xf32, #tpu.memory_space<vmem>>, %arg2: memref<16x32xf32, #tpu.memory_space<vmem>>, %arg3: memref<1x32xf32, #tpu.memory_space<vmem>>, %arg4: memref<32x64xf32, #tpu.memory_space<vmem>>, %arg5: memref<1x64xf32, #tpu.memory_space<vmem>>, %arg6: memref<64x128xf32, #tpu.memory_space<vmem>>, %arg7: memref<1x128xf32, #tpu.memory_space<vmem>>, %arg8: memref<8x4xf32, #tpu.memory_space<vmem>>) attributes {dimension_semantics = [#tpu.dimension_semantics<parallel>], iteration_bounds = array<i64: 1>, scalar_prefetch = 0 : i64, scratch_operands = 0 : i64, tpu.core_type = #tpu.core_type<tc>, window_params = [{transform_indices = @transform_0, window_bounds = array<i64: 8, 16>}, {pipeline_mode = #tpu.pipeline_mode<synchronous>, transform_indices = @transform_1, window_bounds = array<i64: 16, 32>}, {pipeline_mode = #tpu.pipeline_mode<synchronous>, transform_indices = @transform_2, window_bounds = array<i64: 1, 32>}, {pipeline_mode = #tpu.pipeline_mode<synchronous>, transform_indices = @transform_3, window_bounds = array<i64: 32, 64>}, {pipeline_mode = #tpu.pipeline_mode<synchronous>, transform_indices = @transform_4, window_bounds = array<i64: 1, 64>}, {pipeline_mode = #tpu.pipeline_mode<synchronous>, transform_indices = @transform_5, window_bounds = array<i64: 64, 128>}, {pipeline_mode = #tpu.pipeline_mode<synchronous>, transform_indices = @transform_6, window_bounds = array<i64: 1, 128>}, {transform_indices = @transform_7, window_bounds = array<i64: 8, 4>}]} {
    %c0 = arith.constant 0 : index
    %c0_0 = arith.constant 0 : index
    %0 = vector.load %arg1[%c0, %c0_0] : memref<8x16xf32, #tpu.memory_space<vmem>>, vector<8x16xf32>
    %c0_1 = arith.constant 0 : index
    %c0_2 = arith.constant 0 : index
    %1 = vector.load %arg2[%c0_1, %c0_2] : memref<16x32xf32, #tpu.memory_space<vmem>>, vector<16x32xf32>
    %cst = arith.constant dense<0.000000e+00> : vector<8x32xf32>
    %2 = tpu.matmul %0, %1, %cst {dimension_numbers = #tpu.dot_dimension_numbers<[1], [0], [0], [1], [0, 0, 1, 1], [], []>} : vector<8x16xf32>, vector<16x32xf32>, vector<8x32xf32> -> vector<8x32xf32>
    %c0_3 = arith.constant 0 : index
    %c0_4 = arith.constant 0 : index
    %3 = vector.load %arg3[%c0_3, %c0_4] : memref<1x32xf32, #tpu.memory_space<vmem>>, vector<1x32xf32>
    %4 = vector.broadcast %3 : vector<1x32xf32> to vector<8x32xf32>
    %5 = arith.addf %2, %4 : vector<8x32xf32>
    %cst_5 = arith.constant 0.000000e+00 : f32
    %6 = vector.broadcast %cst_5 : f32 to vector<8x32xf32>
    %7 = arith.maximumf %5, %6 : vector<8x32xf32>
    %c0_6 = arith.constant 0 : index
    %c0_7 = arith.constant 0 : index
    %8 = vector.load %arg4[%c0_6, %c0_7] : memref<32x64xf32, #tpu.memory_space<vmem>>, vector<32x64xf32>
    %cst_8 = arith.constant dense<0.000000e+00> : vector<8x64xf32>
    %9 = tpu.matmul %7, %8, %cst_8 {dimension_numbers = #tpu.dot_dimension_numbers<[1], [0], [0], [1], [0, 0, 1, 1], [], []>} : vector<8x32xf32>, vector<32x64xf32>, vector<8x64xf32> -> vector<8x64xf32>
    %c0_9 = arith.constant 0 : index
    %c0_10 = arith.constant 0 : index
    %10 = vector.load %arg5[%c0_9, %c0_10] : memref<1x64xf32, #tpu.memory_space<vmem>>, vector<1x64xf32>
    %11 = vector.broadcast %10 : vector<1x64xf32> to vector<8x64xf32>
    %12 = arith.addf %9, %11 : vector<8x64xf32>
    %cst_11 = arith.constant 0.000000e+00 : f32
    %13 = vector.broadcast %cst_11 : f32 to vector<8x64xf32>
    %14 = arith.maximumf %12, %13 : vector<8x64xf32>
    %c0_12 = arith.constant 0 : index
    %c0_13 = arith.constant 0 : index
    %15 = vector.load %arg6[%c0_12, %c0_13] : memref<64x128xf32, #tpu.memory_space<vmem>>, vector<64x128xf32>
    %cst_14 = arith.constant dense<0.000000e+00> : vector<8x128xf32>
    %16 = tpu.matmul %14, %15, %cst_14 {dimension_numbers = #tpu.dot_dimension_numbers<[1], [0], [0], [1], [0, 0, 1, 1], [], []>} : vector<8x64xf32>, vector<64x128xf32>, vector<8x128xf32> -> vector<8x128xf32>
    %c0_15 = arith.constant 0 : index
    %c0_16 = arith.constant 0 : index
    %17 = vector.load %arg7[%c0_15, %c0_16] : memref<1x128xf32, #tpu.memory_space<vmem>>, vector<1x128xf32>
    %18 = vector.broadcast %17 : vector<1x128xf32> to vector<8x128xf32>
    %19 = arith.addf %16, %18 : vector<8x128xf32>
    %20 = vector.extract_strided_slice %19 {offsets = [0, 0], sizes = [8, 4], strides = [1, 1]} : vector<8x128xf32> to vector<8x4xf32>
    %c0_17 = arith.constant 0 : index
    %c0_18 = arith.constant 0 : index
    %21 = vector.load %arg8[%c0_17, %c0_18] : memref<8x4xf32, #tpu.memory_space<vmem>>, vector<8x4xf32>
    tpu.vector_store %arg8[%c0_17, %c0_18], %20 {strides = array<i32>} : memref<8x4xf32, #tpu.memory_space<vmem>>, vector<8x4xf32>,
    return
  }
  func.func @transform_0(%arg0: i32) -> (i32, i32) {
    %c0_i32 = arith.constant 0 : i32
    %c0_i32_0 = arith.constant 0 : i32
    return %arg0, %c0_i32 : i32, i32
  }
  func.func @transform_1(%arg0: i32) -> (i32, i32) {
    %c0_i32 = arith.constant 0 : i32
    %c0_i32_0 = arith.constant 0 : i32
    %c0_i32_1 = arith.constant 0 : i32
    return %c0_i32, %c0_i32_0 : i32, i32
  }
  func.func @transform_2(%arg0: i32) -> (i32, i32) {
    %c0_i32 = arith.constant 0 : i32
    %c0_i32_0 = arith.constant 0 : i32
    %c0_i32_1 = arith.constant 0 : i32
    return %c0_i32, %c0_i32_0 : i32, i32
  }
  func.func @transform_3(%arg0: i32) -> (i32, i32) {
    %c0_i32 = arith.constant 0 : i32
    %c0_i32_0 = arith.constant 0 : i32
    %c0_i32_1 = arith.constant 0 : i32
    return %c0_i32, %c0_i32_0 : i32, i32
  }
  func.func @transform_4(%arg0: i32) -> (i32, i32) {
    %c0_i32 = arith.constant 0 : i32
    %c0_i32_0 = arith.constant 0 : i32
    %c0_i32_1 = arith.constant 0 : i32
    return %c0_i32, %c0_i32_0 : i32, i32
  }
  func.func @transform_5(%arg0: i32) -> (i32, i32) {
    %c0_i32 = arith.constant 0 : i32
    %c0_i32_0 = arith.constant 0 : i32
    %c0_i32_1 = arith.constant 0 : i32
    return %c0_i32, %c0_i32_0 : i32, i32
  }
  func.func @transform_6(%arg0: i32) -> (i32, i32) {
    %c0_i32 = arith.constant 0 : i32
    %c0_i32_0 = arith.constant 0 : i32
    %c0_i32_1 = arith.constant 0 : i32
    return %c0_i32, %c0_i32_0 : i32, i32
  }
  func.func @transform_7(%arg0: i32) -> (i32, i32) {
    %c0_i32 = arith.constant 0 : i32
    %c0_i32_0 = arith.constant 0 : i32
    return %arg0, %c0_i32 : i32, i32
  }
}

</mosaic_0001>

<bundles_post_ra>
// kernel: tpu_custom_call.1
= control target key start
LH: loop header
LB: loop body
LE: loop exit
PB: predicated region body
PF: predicated region fallthrough
CT: control target
= control target key end

     0   :  { %12 = vsyncpa [#allocation3], 0  ;;  %s583_s0 = inlined_call_operand.hbm [shape: f32[8,16], index: 0, kind: input, shape index: {}]   ;;  %s584_s1 = inlined_call_operand.hbm [shape: f32[16,32], index: 1, kind: input, shape index: {}]   ;;  %s585_s2 = inlined_call_operand.vmem [shape: f32[1,32], index: 2, kind: input, shape index: {}]   ;;  %s586_s3 = inlined_call_operand.hbm [shape: f32[32,64], index: 3, kind: input, shape index: {}]   ;;  %s587_s4 = inlined_call_operand.vmem [shape: f32[1,64], index: 4, kind: input, shape index: {}]   ;;  %s588_s5 = inlined_call_operand.hbm [shape: f32[64,128], index: 5, kind: input, shape index: {}]   ;;  %s589_s6 = inlined_call_operand.vmem [shape: f32[1,128], index: 6, kind: input, shape index: {}]   ;;  %s590_s7 = inlined_call_operand.vmem [shape: f32[8,4], index: 7, kind: output, shape index: {}]  }
   0x1   :  { %13 = vsyncpa [#allocation5], 0 }
   0x2   :  { %14 = vsyncpa [#allocation8], 0  ;;  %s502_s24 = smov [#allocation4]  }
   0x3   :  { %s30_s25 = sshll.u32 %s502_s24, 4  ;;  %s31_s25 = int_to_ptr.vmem [resolvable:$true] %s30_s25 }
   0x4   :  { %s424_s26 = scalar_lea.vmem %s31_s25, 256  ;;  %p429_p1 = scmp.lt.s32.totalorder %s31_s25, %s31_s25 }
   0x5   :  { %p425_p0 = scmp.ne.s32.totalorder %s31_s25, %s424_s26  ;;  %p430_p2 = scmp.lt.s32.totalorder %s424_s26, %s424_s26 }
   0x7   :  { %p431_p3 = por %p430_p2, %p429_p1 }
   0x9   :  { %p432_p4 = pnand %p431_p3, %p425_p0 }
   0xb   :  { %435 = shalt.err (!%p432_p4)
}
   0xc   :  { %s503_s27 = smov 128   ;;  %s504_s28 = smov 8  }
   0xd   :  { %36 = dma.hbm_to_vmem [thread:$0]  %s584_s1, 256, %s31_s25, [#allocation5], %s503_s27, %s503_s27, %s504_s28  }
   0xe   :  { %s505_s8 = smov [#allocation2]   ;;  %s506_s10 = smov [#allocation6]  }
   0xf   :  { %s21_s9 = sshll.u32 %s505_s8, 4  ;;  %s44_s11 = sshll.u32 %s506_s10, 4  ;;  %s22_s9 = int_to_ptr.vmem [resolvable:$true] %s21_s9  ;;  %s45_s11 = int_to_ptr.vmem [resolvable:$true] %s44_s11 }
  0x10   :  { %s444_s12 = scalar_lea.vmem %s22_s9, 128  ;;  %p449_p6 = scmp.lt.s32.totalorder %s22_s9, %s22_s9 }
  0x11   :  { %p445_p5 = scmp.ne.s32.totalorder %s22_s9, %s444_s12  ;;  %p450_p7 = scmp.lt.s32.totalorder %s444_s12, %s444_s12 }
  0x13   :  { %p451_p8 = por %p450_p7, %p449_p6 }
  0x15   :  { %p452_p9 = pnand %p451_p8, %p445_p5 }
  0x17   :  { %455 = shalt.err (!%p452_p9)
}
  0x18   :  { %24 = dma.hbm_to_vmem [thread:$0]  %s583_s0, 128, %s22_s9, [#allocation3]  }
  0x19   :  { %s464_s15 = scalar_lea.vmem %s45_s11, 512  ;;  %p469_p11 = scmp.lt.s32.totalorder %s45_s11, %s45_s11 }
  0x1a   :  { %p465_p10 = scmp.ne.s32.totalorder %s45_s11, %s464_s15  ;;  %p470_p12 = scmp.lt.s32.totalorder %s464_s15, %s464_s15 }
  0x1c   :  { %p471_p13 = por %p470_p12, %p469_p11 }
  0x1e   :  { %p472_p0 = pnand %p471_p13, %p465_p10 }
  0x20   :  { %475 = shalt.err (!%p472_p0)
}
  0x21   :  { %50 = dma.hbm_to_vmem [thread:$0]  %s586_s3, 512, %s45_s11, [#allocation5], %s503_s27, %s503_s27, %s504_s28  }
  0x22   :  { %s507_s17 = smov [#allocation7]  }
  0x23   :  { %s58_s18 = sshll.u32 %s507_s17, 4  ;;  %s59_s18 = int_to_ptr.vmem [resolvable:$true] %s58_s18 }
  0x24   :  { %s484_s19 = scalar_lea.vmem %s59_s18, 1024  ;;  %p489_p2 = scmp.lt.s32.totalorder %s59_s18, %s59_s18 }
  0x25   :  { %p485_p1 = scmp.ne.s32.totalorder %s59_s18, %s484_s19  ;;  %p490_p3 = scmp.lt.s32.totalorder %s484_s19, %s484_s19 }
  0x27   :  { %p491_p4 = por %p490_p3, %p489_p2 }
  0x29   :  { %p492_p5 = pnand %p491_p4, %p485_p1 }
  0x2b   :  { %495 = shalt.err (!%p492_p5)
}
  0x2c   :  { %64 = dma.hbm_to_vmem [thread:$0]  %s588_s5, 1024, %s59_s18, [#allocation8], %s503_s27, %s503_s27, %s504_s28  }
  0x2d   :  { %496 = dma.done.wait [#allocation3], 128  }
  0x2e   :  { %497 = vsyncadd [#allocation3], 4294967168 }
  0x2f   :  { %498 = dma.done.wait [#allocation5], 768  }
  0x30   :  { %499 = vsyncadd [#allocation5], 4294966528 }
  0x31   :  { %500 = dma.done.wait [#allocation8], 1024  }
  0x32   :  { %501 = vsyncadd [#allocation8], 4294966272  ;;  %v508_v0 = vmov 0.0   ;;  %vm509_vm0 = vmmov 0   ;;  %v81_v1 = vld [vmem:[#allocation4 + $0x8] sm:$0xff]  ;;  %v80_v2 = vld [vmem:[#allocation4] sm:$0xff] }
  0x33   :  { %371 = vmatprep.subr.mxu1 %v508_v0  ;;  %375 = vmatprep.mubr.msk.f32.mxu1 %vm509_vm0, %v508_v0  ;;  %v79_v3 = vld [vmem:[#allocation2] sm:$0xff]  ;;  %vm89_vm1 = vcmask 130048   ;;  %v167_v4 = vld [vmem:[#allocation6 + $0x18] sm:$0xff]  ;;  %v166_v5 = vld [vmem:[#allocation6 + $0x10] sm:$0xff]  ;;  %vm175_vm2 = vcmask 261120   ;;  %vm265_vm3 = vcmask 523264  }
  0x34   :  { %389 = vmatprep.subr.mxu0 %v508_v0  ;;  %405 = vmatprep.mubr.msk.f32.mxu0 %vm509_vm0, %v508_v0  ;;  %v165_v6 = vld [vmem:[#allocation6 + $0x8] sm:$0xff]  ;;  %v164_v7 = vld [vmem:[#allocation6] sm:$0xff]  ;;  %v257_v8 = vld [vmem:[#allocation7 + $0x38] sm:$0xff]  ;;  %vm339_vm4 = vcmask 31744  }
  0x35   :  { %372 = vmatpush3.msra.mxu1 %v81_v1  ;;  %v256_v9 = vld [vmem:[#allocation7 + $0x30] sm:$0xff]  ;;  %390 = vmatpush3.msra.mxu0 %v257_v8  ;;  %v255_v10 = vld [vmem:[#allocation7 + $0x28] sm:$0xff]  ;;  %v254_v11 = vld [vmem:[#allocation7 + $0x20] sm:$0xff] }
  0x36   :  { %373 = vmatprep.subr.mxu1 %v508_v0  ;;  %391 = vmatprep.subr.mxu0 %v508_v0  ;;  %v253_v12 = vld [vmem:[#allocation7 + $0x18] sm:$0xff]  ;;  %v348_v13 = vld [vmem:[%s585_s2] ss:$0 sm:$0xff]  ;;  %v252_v18 = vld [vmem:[#allocation7 + $0x10] sm:$0xff] }
  0x37   :  { %374 = vmatpush3.msra.mxu1 %v80_v2  ;;  %392 = vmatpush3.msra.mxu0 %v256_v9  ;;  %v251_v19 = vld [vmem:[#allocation7 + $0x8] sm:$0xff]  ;;  %v250_v20 = vld [vmem:[#allocation7] sm:$0xff] }
  0x38   :  { %376 = vmatmul.mubr.msk.f32.vlgmr.msra.gmra.mxu1 %vm89_vm1, %v79_v3  ;;  %378 = vmatprep.subr.mxu1 %v508_v0  ;;  %v350_v21 = vld [vmem:[%s587_s4] ss:$0 sm:$0xff] }
  0x39   :  { %379 = vmatpush3.msra.mxu1 %v167_v4  ;;  %386 = vmatprep.mubr.msk.f32.mxu1 %vm509_vm0, %v508_v0  ;;  %v352_v26 = vld [vmem:[%s589_s6] ss:$0 sm:$0xff] }
  0x3a   :  { %380 = vmatprep.subr.mxu1 %v508_v0  ;;  %393 = vmatprep.subr.mxu0 %v508_v0 }
  0x3b   :  { %381 = vmatpush3.msra.mxu1 %v166_v5  ;;  %394 = vmatpush3.msra.mxu0 %v255_v10 }
  0x3c   :  { %382 = vmatprep.subr.mxu1 %v508_v0  ;;  %395 = vmatprep.subr.mxu0 %v508_v0 }
  0x3d   :  { %383 = vmatpush3.msra.mxu1 %v165_v6  ;;  %396 = vmatpush3.msra.mxu0 %v254_v11 }
  0x3e   :  { %384 = vmatprep.subr.mxu1 %v508_v0  ;;  %397 = vmatprep.subr.mxu0 %v508_v0 }
  0x3f   :  { %385 = vmatpush3.msra.mxu1 %v164_v7  ;;  %398 = vmatpush3.msra.mxu0 %v253_v12 }
  0x40   :  { %399 = vmatprep.subr.mxu0 %v508_v0 }
  0x41   :  { %400 = vmatpush3.msra.mxu0 %v252_v18 }
  0x42   :  { %401 = vmatprep.subr.mxu0 %v508_v0 }
  0x43   :  { %402 = vmatpush3.msra.mxu0 %v251_v19 }
  0x44   :  { %403 = vmatprep.subr.mxu0 %v508_v0 }
  0x45   :  { %404 = vmatpush3.msra.mxu0 %v250_v20 }
  0xf8   :  { %v159_v14 = vpop.f32.mrf.mxu1 }
  0xf9   :  { %v160_v15 = vadd.f32 %v348_v13, %v159_v14 }
  0xfa   :  { %v377_v16 = vpop.f32.mrf.mxu1 }
  0xfb   :  { %v163_v17 = vmax.f32 %v160_v15, 0.0 }
  0xfd   :  { %387 = vmatmul.mubr.msk.f32.vlgmr.msra.gmra.mxu1 %vm175_vm2, %v163_v17 }
 0x1bd   :  { %v245_v22 = vpop.f32.mrf.mxu1 }
 0x1be   :  { %v246_v23 = vadd.f32 %v350_v21, %v245_v22 }
 0x1bf   :  { %v388_v24 = vpop.f32.mrf.mxu1 }
 0x1c0   :  { %v249_v25 = vmax.f32 %v246_v23, 0.0 }
 0x1c2   :  { %406 = vmatmul.mubr.msk.f32.vlgmr.msra.gmra.mxu0 %vm265_vm3, %v249_v25 }
 0x282   :  { %v335_v27 = vpop.f32.mrf.mxu0 }
 0x283   :  { %v336_v28 = vadd.f32 %v352_v26, %v335_v27 }
 0x284   :  { %v407_v29 = vpop.f32.mrf.mxu0 }
 0x285   :  { %340 = vst.msk [vmem:[%s590_s7] sm:$0xff] %vm339_vm4, %v336_v28 }
 0x286   :  { %345 = vsyncpa [#allocation3], 1 }
 0x287   :  { %346 = vsyncpa [#allocation5], 1 }
 0x288   :  { %347 = vsyncpa [#allocation8], 1 }

</bundles_post_ra>
